<compile_context>
chip_gen: v6e
topology: v6e:2x2x1
jax: 0.10.0
libtpu: 0.0.40
codegen_flags: <defaults>
</compile_context>

<pallas_src>
import jax
import jax.numpy as jnp
from jax.experimental import pallas as pl
from jax.experimental.pallas import tpu as pltpu


def _fused_channel_mix_kernel(x_ref, w_ref, b_ref, o_ref):
    # x_ref: (Cin, TILE) f32 in VMEM (lane-dense along TILE)
    # w_ref: (Cin, Cout) f32 in SMEM, b_ref: (Cout,) f32 in SMEM
    # o_ref: (Cout, TILE)
    cin, _ = x_ref.shape
    cout = o_ref.shape[0]

    # Load each input channel row once (1, TILE); full-128-lane vregs.
    xs = [x_ref[k:k + 1, :].astype(jnp.float32) for k in range(cin)]

    # Unrolled VPU FMAs: out[j, :] = relu(sum_k x[k, :] * W[k, j] + b[j])
    for j in range(cout):
        acc = xs[0] * w_ref[0, j]
        for k in range(1, cin):
            acc = acc + xs[k] * w_ref[k, j]
        acc = acc + b_ref[j]
        o_ref[j:j + 1, :] = jnp.maximum(acc, 0.0).astype(o_ref.dtype)


def _pick_spatial_tile(n_batch, hw, tile_spatial):
    ts = min(tile_spatial, hw)
    if ts < hw:
        # interior blocks must keep the lane dim a multiple of 128
        ts = max(128, (ts // 128) * 128)
    # v7x megacore: prefer >= 2 grid steps so both TensorCores get work
    if n_batch * pl.cdiv(hw, ts) < 2 and hw > 128:
        half = (hw + 1) // 2
        ts = max(128, ((half + 127) // 128) * 128)
    return ts


def model_forward(x_nchw, w_ct, b_ct, w_lin, b_lin, *, tile_spatial=8192):
    """x_nchw: (N, Cin, H, W).  Returns (N, Cout, H, W) = relu(linear(convT(x)))."""
    N, Cin, H, W = x_nchw.shape
    Cout = w_lin.shape[0]
    HW = H * W

    # Fold the two channel mixes into one (exact algebra, done once in f32):
    #   v2 = (x @ Wct + bct) @ Wlin^T + blin  ==  x @ (Wct @ Wlin^T) + (bct @ Wlin^T + blin)
    wlt = w_lin.T.astype(jnp.float32)                     # (Cmid, Cout)
    w_comb = w_ct.astype(jnp.float32) @ wlt               # (Cin, Cout)
    b_comb = b_ct.astype(jnp.float32) @ wlt + b_lin.astype(jnp.float32)  # (Cout,)

    x3 = x_nchw.reshape(N, Cin, HW)                       # free reshape (no transpose)

    ts = _pick_spatial_tile(N, HW, tile_spatial)
    grid = (N, pl.cdiv(HW, ts))

    out3 = pl.pallas_call(
        _fused_channel_mix_kernel,
        out_shape=jax.ShapeDtypeStruct((N, Cout, HW), x_nchw.dtype),
        grid_spec=pltpu.PrefetchScalarGridSpec(
            num_scalar_prefetch=0,
            grid=grid,
            in_specs=[
                # (None, Cin, ts): batch dim squeezed; kernel sees (Cin, ts)
                pl.BlockSpec((None, Cin, ts), lambda n, s: (n, 0, s)),
                # tiny folded weight / bias live in SMEM as scalars
                pl.BlockSpec(memory_space=pltpu.MemorySpace.SMEM),
                pl.BlockSpec(memory_space=pltpu.MemorySpace.SMEM),
            ],
            out_specs=pl.BlockSpec((None, Cout, ts), lambda n, s: (n, 0, s)),
        ),
        compiler_params=pltpu.CompilerParams(
            dimension_semantics=("parallel", "parallel")),
    )(x3, w_comb, b_comb)

    return out3.reshape(N, Cout, H, W)                    # free reshape


def _reference(x_nchw, w_ct, b_ct, w_lin, b_lin):
    # Unfused reference: 1x1 conv-transpose channel mix, then Linear over channels, ReLU.
    v1 = jnp.einsum("nchw,cm->nmhw", x_nchw, w_ct) + b_ct[None, :, None, None]
    v2 = jnp.einsum("nmhw,om->nohw", v1, w_lin) + b_lin[None, :, None, None]
    return jnp.maximum(v2, 0.0)


if __name__ == "__main__":
    key = jax.random.PRNGKey(0)
    k_x, k_wct, k_bct, k_wl, k_bl = jax.random.split(key, 5)

    # Small shapes consistent with the module: 3 input channels, NCHW layout.
    N, Cin, H, W = 2, 3, 16, 16
    Cmid, Cout = 3, 4

    x = jax.random.normal(k_x, (N, Cin, H, W), dtype=jnp.float32)

    # ConvTranspose2d(3,3,(1,1)) weight is (Cin, Cout, 1, 1) -> squeezed (Cin, Cmid)
    w_ct = jax.random.normal(k_wct, (Cin, Cmid), dtype=jnp.float32) * 0.5
    b_ct = jax.random.normal(k_bct, (Cmid,), dtype=jnp.float32) * 0.1
    # Linear(3,4) weight is (out_features, in_features) = (4, 3)
    w_lin = jax.random.normal(k_wl, (Cout, Cmid), dtype=jnp.float32) * 0.5
    b_lin = jax.random.normal(k_bl, (Cout,), dtype=jnp.float32) * 0.1

    fwd = jax.jit(model_forward)
    out = fwd(x, w_ct, b_ct, w_lin, b_lin)
    out = jax.block_until_ready(out)

    ref = _reference(x, w_ct, b_ct, w_lin, b_lin)
    assert out.shape == (N, Cout, H, W), out.shape
    assert jnp.allclose(out, ref, atol=1e-5, rtol=1e-5), "mismatch vs reference"

    print("KERNEL_OK")
</pallas_src>

<mosaic_0001>
module attributes {stable_mosaic.version = 11 : i64} {
  func.func @_fused_channel_mix_kernel(%arg0: i32, %arg1: i32, %arg2: memref<1x3x256xf32, #tpu.memory_space<vmem>>, %arg3: memref<3x4xf32, #tpu.memory_space<smem>>, %arg4: memref<4xf32, #tpu.memory_space<smem>>, %arg5: memref<1x4x256xf32, #tpu.memory_space<vmem>>) attributes {dimension_semantics = [#tpu.dimension_semantics<parallel>, #tpu.dimension_semantics<parallel>], iteration_bounds = array<i64: 2, 1>, scalar_prefetch = 0 : i64, scratch_operands = 0 : i64, tpu.core_type = #tpu.core_type<tc>, window_params = [{transform_indices = @transform_0, window_bounds = array<i64: 1, 3, 256>}, {transform_indices = @transform_1, window_bounds = array<i64: 3, 4>}, {transform_indices = @transform_2, window_bounds = array<i64: 4>}, {transform_indices = @transform_3, window_bounds = array<i64: 1, 4, 256>}]} {
    %c0 = arith.constant 0 : index
    %c0_0 = arith.constant 0 : index
    %c0_1 = arith.constant 0 : index
    %0 = vector.load %arg2[%c0, %c0_0, %c0_1] : memref<1x3x256xf32, #tpu.memory_space<vmem>>, vector<1x1x256xf32>
    %1 = vector.shape_cast %0 : vector<1x1x256xf32> to vector<1x256xf32>
    %c0_2 = arith.constant 0 : index
    %c1 = arith.constant 1 : index
    %c0_3 = arith.constant 0 : index
    %2 = vector.load %arg2[%c0_2, %c1, %c0_3] : memref<1x3x256xf32, #tpu.memory_space<vmem>>, vector<1x1x256xf32>
    %3 = vector.shape_cast %2 : vector<1x1x256xf32> to vector<1x256xf32>
    %c0_4 = arith.constant 0 : index
    %c2 = arith.constant 2 : index
    %c0_5 = arith.constant 0 : index
    %4 = vector.load %arg2[%c0_4, %c2, %c0_5] : memref<1x3x256xf32, #tpu.memory_space<vmem>>, vector<1x1x256xf32>
    %5 = vector.shape_cast %4 : vector<1x1x256xf32> to vector<1x256xf32>
    %c0_6 = arith.constant 0 : index
    %c0_7 = arith.constant 0 : index
    %6 = memref.load %arg3[%c0_6, %c0_7] : memref<3x4xf32, #tpu.memory_space<smem>>
    %7 = vector.broadcast %6 : f32 to vector<1x256xf32>
    %8 = arith.mulf %1, %7 : vector<1x256xf32>
    %c1_8 = arith.constant 1 : index
    %c0_9 = arith.constant 0 : index
    %9 = memref.load %arg3[%c1_8, %c0_9] : memref<3x4xf32, #tpu.memory_space<smem>>
    %10 = vector.broadcast %9 : f32 to vector<1x256xf32>
    %11 = arith.mulf %3, %10 : vector<1x256xf32>
    %12 = arith.addf %8, %11 : vector<1x256xf32>
    %c2_10 = arith.constant 2 : index
    %c0_11 = arith.constant 0 : index
    %13 = memref.load %arg3[%c2_10, %c0_11] : memref<3x4xf32, #tpu.memory_space<smem>>
    %14 = vector.broadcast %13 : f32 to vector<1x256xf32>
    %15 = arith.mulf %5, %14 : vector<1x256xf32>
    %16 = arith.addf %12, %15 : vector<1x256xf32>
    %c0_12 = arith.constant 0 : index
    %17 = memref.load %arg4[%c0_12] : memref<4xf32, #tpu.memory_space<smem>>
    %18 = vector.broadcast %17 : f32 to vector<1x256xf32>
    %19 = arith.addf %16, %18 : vector<1x256xf32>
    %cst = arith.constant 0.000000e+00 : f32
    %20 = vector.broadcast %cst : f32 to vector<1x256xf32>
    %21 = arith.maximumf %19, %20 : vector<1x256xf32>
    %c0_13 = arith.constant 0 : index
    %c0_14 = arith.constant 0 : index
    %c0_15 = arith.constant 0 : index
    %22 = vector.load %arg5[%c0_13, %c0_14, %c0_15] : memref<1x4x256xf32, #tpu.memory_space<vmem>>, vector<1x1x256xf32>
    %23 = vector.shape_cast %22 : vector<1x1x256xf32> to vector<1x256xf32>
    %24 = vector.shape_cast %21 : vector<1x256xf32> to vector<1x1x256xf32>
    tpu.vector_store %arg5[%c0_13, %c0_14, %c0_15], %24 {strides = array<i32>} : memref<1x4x256xf32, #tpu.memory_space<vmem>>, vector<1x1x256xf32>,
    %c0_16 = arith.constant 0 : index
    %c1_17 = arith.constant 1 : index
    %25 = memref.load %arg3[%c0_16, %c1_17] : memref<3x4xf32, #tpu.memory_space<smem>>
    %26 = vector.broadcast %25 : f32 to vector<1x256xf32>
    %27 = arith.mulf %1, %26 : vector<1x256xf32>
    %c1_18 = arith.constant 1 : index
    %c1_19 = arith.constant 1 : index
    %28 = memref.load %arg3[%c1_18, %c1_19] : memref<3x4xf32, #tpu.memory_space<smem>>
    %29 = vector.broadcast %28 : f32 to vector<1x256xf32>
    %30 = arith.mulf %3, %29 : vector<1x256xf32>
    %31 = arith.addf %27, %30 : vector<1x256xf32>
    %c2_20 = arith.constant 2 : index
    %c1_21 = arith.constant 1 : index
    %32 = memref.load %arg3[%c2_20, %c1_21] : memref<3x4xf32, #tpu.memory_space<smem>>
    %33 = vector.broadcast %32 : f32 to vector<1x256xf32>
    %34 = arith.mulf %5, %33 : vector<1x256xf32>
    %35 = arith.addf %31, %34 : vector<1x256xf32>
    %c1_22 = arith.constant 1 : index
    %36 = memref.load %arg4[%c1_22] : memref<4xf32, #tpu.memory_space<smem>>
    %37 = vector.broadcast %36 : f32 to vector<1x256xf32>
    %38 = arith.addf %35, %37 : vector<1x256xf32>
    %cst_23 = arith.constant 0.000000e+00 : f32
    %39 = vector.broadcast %cst_23 : f32 to vector<1x256xf32>
    %40 = arith.maximumf %38, %39 : vector<1x256xf32>
    %c0_24 = arith.constant 0 : index
    %c1_25 = arith.constant 1 : index
    %c0_26 = arith.constant 0 : index
    %41 = vector.load %arg5[%c0_24, %c1_25, %c0_26] : memref<1x4x256xf32, #tpu.memory_space<vmem>>, vector<1x1x256xf32>
    %42 = vector.shape_cast %41 : vector<1x1x256xf32> to vector<1x256xf32>
    %43 = vector.shape_cast %40 : vector<1x256xf32> to vector<1x1x256xf32>
    tpu.vector_store %arg5[%c0_24, %c1_25, %c0_26], %43 {strides = array<i32>} : memref<1x4x256xf32, #tpu.memory_space<vmem>>, vector<1x1x256xf32>,
    %c0_27 = arith.constant 0 : index
    %c2_28 = arith.constant 2 : index
    %44 = memref.load %arg3[%c0_27, %c2_28] : memref<3x4xf32, #tpu.memory_space<smem>>
    %45 = vector.broadcast %44 : f32 to vector<1x256xf32>
    %46 = arith.mulf %1, %45 : vector<1x256xf32>
    %c1_29 = arith.constant 1 : index
    %c2_30 = arith.constant 2 : index
    %47 = memref.load %arg3[%c1_29, %c2_30] : memref<3x4xf32, #tpu.memory_space<smem>>
    %48 = vector.broadcast %47 : f32 to vector<1x256xf32>
    %49 = arith.mulf %3, %48 : vector<1x256xf32>
    %50 = arith.addf %46, %49 : vector<1x256xf32>
    %c2_31 = arith.constant 2 : index
    %c2_32 = arith.constant 2 : index
    %51 = memref.load %arg3[%c2_31, %c2_32] : memref<3x4xf32, #tpu.memory_space<smem>>
    %52 = vector.broadcast %51 : f32 to vector<1x256xf32>
    %53 = arith.mulf %5, %52 : vector<1x256xf32>
    %54 = arith.addf %50, %53 : vector<1x256xf32>
    %c2_33 = arith.constant 2 : index
    %55 = memref.load %arg4[%c2_33] : memref<4xf32, #tpu.memory_space<smem>>
    %56 = vector.broadcast %55 : f32 to vector<1x256xf32>
    %57 = arith.addf %54, %56 : vector<1x256xf32>
    %cst_34 = arith.constant 0.000000e+00 : f32
    %58 = vector.broadcast %cst_34 : f32 to vector<1x256xf32>
    %59 = arith.maximumf %57, %58 : vector<1x256xf32>
    %c0_35 = arith.constant 0 : index
    %c2_36 = arith.constant 2 : index
    %c0_37 = arith.constant 0 : index
    %60 = vector.load %arg5[%c0_35, %c2_36, %c0_37] : memref<1x4x256xf32, #tpu.memory_space<vmem>>, vector<1x1x256xf32>
    %61 = vector.shape_cast %60 : vector<1x1x256xf32> to vector<1x256xf32>
    %62 = vector.shape_cast %59 : vector<1x256xf32> to vector<1x1x256xf32>
    tpu.vector_store %arg5[%c0_35, %c2_36, %c0_37], %62 {strides = array<i32>} : memref<1x4x256xf32, #tpu.memory_space<vmem>>, vector<1x1x256xf32>,
    %c0_38 = arith.constant 0 : index
    %c3 = arith.constant 3 : index
    %63 = memref.load %arg3[%c0_38, %c3] : memref<3x4xf32, #tpu.memory_space<smem>>
    %64 = vector.broadcast %63 : f32 to vector<1x256xf32>
    %65 = arith.mulf %1, %64 : vector<1x256xf32>
    %c1_39 = arith.constant 1 : index
    %c3_40 = arith.constant 3 : index
    %66 = memref.load %arg3[%c1_39, %c3_40] : memref<3x4xf32, #tpu.memory_space<smem>>
    %67 = vector.broadcast %66 : f32 to vector<1x256xf32>
    %68 = arith.mulf %3, %67 : vector<1x256xf32>
    %69 = arith.addf %65, %68 : vector<1x256xf32>
    %c2_41 = arith.constant 2 : index
    %c3_42 = arith.constant 3 : index
    %70 = memref.load %arg3[%c2_41, %c3_42] : memref<3x4xf32, #tpu.memory_space<smem>>
    %71 = vector.broadcast %70 : f32 to vector<1x256xf32>
    %72 = arith.mulf %5, %71 : vector<1x256xf32>
    %73 = arith.addf %69, %72 : vector<1x256xf32>
    %c3_43 = arith.constant 3 : index
    %74 = memref.load %arg4[%c3_43] : memref<4xf32, #tpu.memory_space<smem>>
    %75 = vector.broadcast %74 : f32 to vector<1x256xf32>
    %76 = arith.addf %73, %75 : vector<1x256xf32>
    %cst_44 = arith.constant 0.000000e+00 : f32
    %77 = vector.broadcast %cst_44 : f32 to vector<1x256xf32>
    %78 = arith.maximumf %76, %77 : vector<1x256xf32>
    %c0_45 = arith.constant 0 : index
    %c3_46 = arith.constant 3 : index
    %c0_47 = arith.constant 0 : index
    %79 = vector.load %arg5[%c0_45, %c3_46, %c0_47] : memref<1x4x256xf32, #tpu.memory_space<vmem>>, vector<1x1x256xf32>
    %80 = vector.shape_cast %79 : vector<1x1x256xf32> to vector<1x256xf32>
    %81 = vector.shape_cast %78 : vector<1x256xf32> to vector<1x1x256xf32>
    tpu.vector_store %arg5[%c0_45, %c3_46, %c0_47], %81 {strides = array<i32>} : memref<1x4x256xf32, #tpu.memory_space<vmem>>, vector<1x1x256xf32>,
    return
  }
  func.func @transform_0(%arg0: i32, %arg1: i32) -> (i32, i32, i32) {
    %c0_i32 = arith.constant 0 : i32
    %c0_i32_0 = arith.constant 0 : i32
    return %arg0, %c0_i32, %arg1 : i32, i32, i32
  }
  func.func @transform_1(%arg0: i32, %arg1: i32) -> (i32, i32) {
    %c0_i32 = arith.constant 0 : i32
    %c0_i32_0 = arith.constant 0 : i32
    %c0_i32_1 = arith.constant 0 : i32
    return %c0_i32, %c0_i32_0 : i32, i32
  }
  func.func @transform_2(%arg0: i32, %arg1: i32) -> i32 {
    %c0_i32 = arith.constant 0 : i32
    %c0_i32_0 = arith.constant 0 : i32
    return %c0_i32 : i32
  }
  func.func @transform_3(%arg0: i32, %arg1: i32) -> (i32, i32, i32) {
    %c0_i32 = arith.constant 0 : i32
    %c0_i32_0 = arith.constant 0 : i32
    return %arg0, %c0_i32, %arg1 : i32, i32, i32
  }
}

</mosaic_0001>

<bundles_post_ra>
// kernel: model_forward.1
= control target key start
LH: loop header
LB: loop body
LE: loop exit
PB: predicated region body
PF: predicated region fallthrough
CT: control target
= control target key end

     0   :  { %8 = vsyncpa [#allocation3], 0  ;;  %s690_s0 = inlined_call_operand.vmem [shape: f32[2,3,256], index: 0, kind: input, shape index: {}]   ;;  %s691_s1 = inlined_call_operand.vmem [shape: f32[3,4], index: 1, kind: input, shape index: {}]   ;;  %s692_s2 = inlined_call_operand.vmem [shape: f32[4], index: 2, kind: input, shape index: {}]   ;;  %s693_s3 = inlined_call_operand.vmem [shape: f32[2,4,256], index: 3, kind: output, shape index: {}]  }
   0x1   :  { %9 = vsyncpa [#allocation5], 0  ;;  %s587_s12 = smov 0   ;;  %s589_s13 = smov 0  }
   0x2   :  { %s591_s14 = smov 0  }
   0x3 LB: > { %s422_s15 = sadd.s32 4294967295, %s563_s14   ;;  %s27_s16 = sadd.s32 1, %s559_s13  ;;  %s563_s14 = sphi %s591_s14, %s15_s14   ;;  %s559_s13 = sphi %s589_s13, %s705_s13   ;;  %s555_s12 = sphi %s587_s12, %s704_s12  }
   0x4   : > { %p29_p0 = scmp.ge.s32.totalorder %s27_s16, 2  ;;  %p424_p1 = scmp.ge.s32.totalorder %s563_s14, 1 }
   0x5   : > { %p130_p2 = scmp.lt.s32.totalorder %s563_s14, 3  ;;  %p612_p4 = scmp.eq.s32.totalorder %s422_s15, 0 }
   0x6   : > { %s707_s16 = smov (%p29_p0, %s27_s16), 0  ;;  %s143_s21 = sshll.u32 %s691_s1, 4  ;;  %s144_s21 = int_to_ptr.vmem [resolvable:$true] %s143_s21 }
   0x7   : > { %p608_p3 = pnand %p424_p1, %p130_p2  ;;  %s154_s24 = sshll.u32 %s692_s2, 4  ;;  %s155_s24 = int_to_ptr.vmem [resolvable:$true] %s154_s24 }
   0x8   : > { %s698_s18 = scalar_select %p612_p4, 1, 0 }
   0x9   : > { %s697_s17 = scalar_select %p608_p3, 1, 0 }
   0xa   : > { %p466_p5 = pneg %p608_p3  ;;  %s503_s26 = scalar_lea.vmem %s144_s21, 64 }
   0xb   : > { %p504_p7 = scmp.ne.s32.totalorder %s144_s21, %s503_s26  ;;  %p511_p11 = scmp.lt.s32.totalorder %s144_s21, %s144_s21 }
   0xc   : > { %p626_p6 = pnand %p612_p4, %p466_p5  ;;  %p512_p12 = scmp.lt.s32.totalorder %s503_s26, %s503_s26 }
   0xe   : > { %p505_p8 = pneg %p626_p6  ;;  %p513_p13 = por %p512_p12, %p511_p11 }
  0x10   : > { %p506_p9 = pnand %p505_p8, %p504_p7 }
  0x12   : > { %p507_p10 = pneg %p506_p9 }
  0x14   : > { %p514_p0 = pnand %p513_p13, %p507_p10 }
  0x16   : > { %517 = shalt.err (!%p514_p0)
}
  0x17   : > { %s565_s27 = smov [#allocation2]   ;;  %s518_s28 = scalar_lea.vmem %s155_s24, 16 }
  0x18   : > { %469 = dma.vmem_to_smem (!%p626_p6), %s144_s21, 64, %s565_s27, [#allocation3]  }
  0x19   : > { %p519_p1 = scmp.ne.s32.totalorder %s155_s24, %s518_s28  ;;  %p526_p4 = scmp.lt.s32.totalorder %s155_s24, %s155_s24 }
  0x1a   : > { %p527_p3 = scmp.lt.s32.totalorder %s518_s28, %s518_s28 }
  0x1b   : > { %p521_p2 = pnand %p519_p1, %p505_p8 }
  0x1c   : > { %p528_p7 = por %p527_p3, %p526_p4 }
  0x1d   : > { %p522_p5 = pneg %p521_p2 }
  0x1f   : > { %p529_p9 = pnand %p528_p7, %p522_p5 }
  0x21   : > { %532 = shalt.err (!%p529_p9)
}
  0x22   : > { %s566_s29 = smov [#allocation4]   ;;  %p700_p10 = scmp.ne.s32.totalorder %s697_s17, 0 }
  0x23   : > { %472 = dma.vmem_to_smem (!%p626_p6), %s155_s24, 16, %s566_s29, [#allocation5]  }
  0x24   : > { %180 = sbr.rel (%p700_p10) target bundleno = 78 (0x4e), region = 32  ;;  %p701_p11 = scmp.ne.s32.totalorder (!%p700_p10), %s698_s18, 0 }
  0x29   : > { %546 = dma.done.wait (%p701_p11), [#allocation3], 64  }
  0x2a   : > { %548 = vsyncadd (%p701_p11), [#allocation3], 4294967232 }
  0x2b   : > { %550 = dma.done.wait (%p701_p11), [#allocation5], 16  }
  0x2c   : > { %552 = vsyncadd (%p701_p11), [#allocation5], 4294967280 }
  0x2d   : > { %190 = sfence }
  0x2e   : > { %p218_p3 = scmp.lt.s32.totalorder %s555_s12, 1  ;;  %s242_s30 = sld [smem:[#allocation2]]  ;;  %v257_v11 = vlaneseq }
  0x2f   : > { %s437_s4 = sld [smem:[#allocation2 + $0x80]] }
  0x30   : > { %s709_s12 = smov (!%p218_p3, %s555_s12), 1  ;;  %s438_s5 = sld [smem:[#allocation2 + $0x100]]  ;;  %vm663_vm0 = vcmp.lt.s32.totalorder %v257_v11, 256 }
  0x31   : > { %s456_s6 = sshll.u32 %s709_s12, 3  ;;  %s253_s7 = sld [smem:[#allocation4]] }
  0x32   : > { %s225_s10 = scalar_lea.vmem %s690_s0, %s456_s6  ;;  %s439_s11 = sld [smem:[#allocation2 + $0x1]] }
  0x33   : > { %v237_v0 = vld [vmem:[%s225_s10] ss:$4 sm:$0x3]  ;;  %v435_v1 = vld [vmem:[%s225_s10 + $0x1] ss:$4 sm:$0x3]  ;;  %s661_s24 = scalar_lea.vmem %s693_s3, %s456_s6 }
  0x34   : > { %v243_v2 = vstv %s242_s30  ;;  %v436_v3 = vld [vmem:[%s225_s10 + $0x2] ss:$4 sm:$0x3]  ;;  %s440_s15 = sld [smem:[#allocation2 + $0x81]] }
  0x35   : > { %v244_v4 = vmul.f32 %v243_v2, %v237_v0  ;;  %v246_v5 = vstv %s437_s4  ;;  %s441_s17 = sld [smem:[#allocation2 + $0x101]] }
  0x36   : > { %v247_v6 = vmul.f32 %v435_v1, %v246_v5  ;;  %v250_v7 = vstv %s438_s5  ;;  %s654_s18 = sld [smem:[#allocation4 + $0x1]] }
  0x37   : > { %v251_v9 = vmul.f32 %v436_v3, %v250_v7  ;;  %v254_v10 = vstv %s253_s7  ;;  %s444_s12 = sld [smem:[#allocation2 + $0x2]] }
  0x38   : > { %v248_v8 = vadd.f32 %v247_v6, %v244_v4  ;;  %s445_s19 = sld [smem:[#allocation2 + $0x82]]  ;;  %v263_v13 = vstv %s439_s11 }
  0x39   : > { %s446_s20 = sld [smem:[#allocation2 + $0x102]]  ;;  %v264_v15 = vmul.f32 %v263_v13, %v237_v0 }
  0x3a   : > { %v252_v12 = vadd.f32 %v251_v9, %v248_v8  ;;  %v266_v16 = vstv %s440_s15  ;;  %s656_s21 = sld [smem:[#allocation4 + $0x2]] }
  0x3b   : > { %v267_v18 = vmul.f32 %v435_v1, %v266_v16  ;;  %v270_v19 = vstv %s441_s17  ;;  %s449_s25 = sld [smem:[#allocation2 + $0x3]] }
  0x3c   : > { %v255_v14 = vadd.f32 %v254_v10, %v252_v12  ;;  %v271_v21 = vmul.f32 %v436_v3, %v270_v19  ;;  %s450_s26 = sld [smem:[#allocation2 + $0x83]]  ;;  %v274_v24 = vstv %s654_s18 }
  0x3d   : > { %v268_v22 = vadd.f32 %v267_v18, %v264_v15  ;;  %v280_v23 = vstv %s444_s12  ;;  %s451_s27 = sld [smem:[#allocation2 + $0x103]] }
  0x3e   : > { %v256_v20 = vmax.f32 %v255_v14, 0.0  ;;  %v281_v25 = vmul.f32 %v280_v23, %v237_v0  ;;  %v283_v26 = vstv %s445_s19  ;;  %s452_s28 = sld [smem:[#allocation4 + $0x3]] }
  0x3f   : > { %v272_v27 = vadd.f32 %v271_v21, %v268_v22  ;;  %v284_v28 = vmul.f32 %v435_v1, %v283_v26  ;;  %v287_v29 = vstv %s446_s20 }
  0x40   : > { %261 = vst.msk [vmem:[%s661_s24] ss:$4 sm:$0x3] %vm663_vm0, %v256_v20  ;;  %v288_v30 = vmul.f32 %v436_v3, %v287_v29  ;;  %v291_v34 = vstv %s656_s21 }
  0x41   : > { %v275_v31 = vadd.f32 %v274_v24, %v272_v27  ;;  %v285_v32 = vadd.f32 %v284_v28, %v281_v25  ;;  %v297_v33 = vstv %s449_s25 }
  0x42   : > { %v298_v35 = vmul.f32 %v297_v33, %v237_v0  ;;  %v300_v36 = vstv %s450_s26 }
  0x43   : > { %v276_v37 = vmax.f32 %v275_v31, 0.0  ;;  %v289_v38 = vadd.f32 %v288_v30, %v285_v32  ;;  %v301_v39 = vmul.f32 %v435_v1, %v300_v36  ;;  %v304_v40 = vstv %s451_s27 }
  0x44   : > { %v305_v41 = vmul.f32 %v436_v3, %v304_v40  ;;  %v308_v44 = vstv %s452_s28 }
  0x45   : > { %443 = vst.msk [vmem:[%s661_s24 + $0x1] ss:$4 sm:$0x3] %vm663_vm0, %v276_v37  ;;  %v292_v42 = vadd.f32 %v291_v34, %v289_v38  ;;  %v302_v43 = vadd.f32 %v301_v39, %v298_v35 }
  0x47   : > { %v293_v45 = vmax.f32 %v292_v42, 0.0  ;;  %v306_v46 = vadd.f32 %v305_v41, %v302_v43 }
  0x49   : > { %448 = vst.msk [vmem:[%s661_s24 + $0x2] ss:$4 sm:$0x3] %vm663_vm0, %v293_v45  ;;  %v309_v47 = vadd.f32 %v308_v44, %v306_v46 }
  0x4b   : > { %v310_v48 = vmax.f32 %v309_v47, 0.0 }
  0x4d   : > { %453 = vst.msk [vmem:[%s661_s24 + $0x3] ss:$4 sm:$0x3] %vm663_vm0, %v310_v48 }
  0x4e PF: > { %s15_s14 = sadd.s32 1, %s563_s14   ;;  %s704_s12 = smov %s559_s13 }
  0x4f   : > { %p12_p4 = scmp.ge.s32.totalorder %s15_s14, 4   ;;  %s705_s13 = smov %s707_s16 }
  0x51   :  { %14 = sbr.rel (!%p12_p4) target bundleno = 3 (0x3), region = 76 }
  0x56   :  { %343 = vsyncpa [#allocation3], 1 }
  0x57   :  { %345 = vsyncpa [#allocation3 + $0x1], 1 }
  0x58   :  { %346 = vsyncpa [#allocation5], 1 }

</bundles_post_ra>
